<compile_context>
chip_gen: v5e
topology: v5e:2x2
jax: 0.10.0
libtpu: 0.0.40
codegen_flags: <defaults>
</compile_context>

<pallas_src>
import math

import jax
import jax.numpy as jnp
from jax.experimental import pallas as pl
from jax.experimental.pallas import tpu as pltpu


def _newcoord_kernel(s_ref, x_ref, o_ref):
    # x_ref: (TILE_ROWS, d_blk) tile in VMEM; s_ref: (1, 3) broadcasts over rows.
    o_ref[...] = x_ref[:, 0:3] * s_ref[...]


def newcoord(s, x, *, tile_rows=2048, force_pallas=False):
    """Pallas equivalent of Newcoord(s).forward(x) = s * x[..., 0:3]."""
    x = jnp.asarray(x)
    dtype = x.dtype
    lead_shape = x.shape[:-1]
    D = x.shape[-1]
    assert D >= 3, "last dim of x must be >= 3"

    n_rows = math.prod(lead_shape) if lead_shape else 1
    s_vec = jnp.broadcast_to(jnp.asarray(s, dtype=dtype), (3,))

    # Tiny inputs: let XLA fuse a plain multiply instead of paying the
    # pallas_call launch / per-step overhead.
    if not force_pallas and n_rows < 2048:
        return s_vec * x[..., 0:3]

    x2d = x.reshape(n_rows, D)
    s_arr = s_vec.reshape(1, 3)

    # Row tile: full extent if it fits one block, else a large multiple of 8
    # (default 2048 rows) so each grid step's DMA dwarfs the ~0.35us/step cost.
    tile_r = n_rows if n_rows <= tile_rows else tile_rows
    # Only DMA the first min(D, 128) feature columns (block last dim must be a
    # multiple of 128 or equal the full array dim).
    d_blk = D if D < 128 else 128
    grid = (pl.cdiv(n_rows, tile_r),)

    out2d = pl.pallas_call(
        _newcoord_kernel,
        out_shape=jax.ShapeDtypeStruct((n_rows, 3), dtype),
        grid=grid,
        in_specs=[
            pl.BlockSpec((1, 3), lambda i: (0, 0)),           # s: constant block
            pl.BlockSpec((tile_r, d_blk), lambda i: (i, 0)),  # x: row tile
        ],
        out_specs=pl.BlockSpec((tile_r, 3), lambda i: (i, 0)),
        compiler_params=pltpu.CompilerParams(
            dimension_semantics=("parallel",),
            vmem_limit_bytes=32 * 1024 * 1024,
        ),
    )(s_arr, x2d)

    return out2d.reshape(*lead_shape, 3)


if __name__ == "__main__":
    key = jax.random.PRNGKey(0)
    k1, k2 = jax.random.split(key)

    s = jnp.array([1.0, 2.0, 0.5], dtype=jnp.float32)  # deterministic buffer

    # Small shape consistent with the module (batch of feature vectors whose
    # first 3 entries are 3-D coordinates).  Force the Pallas path.
    x_small = jax.random.normal(k1, (2, 16, 8), dtype=jnp.float32)
    out_small = newcoord(s, x_small, force_pallas=True)
    jax.block_until_ready(out_small)
    ref_small = s * x_small[..., 0:3]
    assert out_small.shape == ref_small.shape == (2, 16, 3)
    assert jnp.allclose(out_small, ref_small, atol=1e-6), "small-case mismatch"

    # Larger shape to exercise the row-tiled grid + a partial last block
    # (10000 rows -> 5 grid steps of 2048 rows, last step ragged).
    x_big = jax.random.normal(k2, (4, 2500, 8), dtype=jnp.float32)
    out_big = newcoord(s, x_big)
    jax.block_until_ready(out_big)
    ref_big = s * x_big[..., 0:3]
    assert out_big.shape == ref_big.shape == (4, 2500, 3)
    assert jnp.allclose(out_big, ref_big, atol=1e-6), "large-case mismatch"

    print("KERNEL_OK")
</pallas_src>

<mosaic_0001>
module attributes {stable_mosaic.version = 11 : i64} {
  func.func @_newcoord_kernel(%arg0: i32, %arg1: memref<1x3xf32, #tpu.memory_space<vmem>>, %arg2: memref<32x8xf32, #tpu.memory_space<vmem>>, %arg3: memref<32x3xf32, #tpu.memory_space<vmem>>) attributes {dimension_semantics = [#tpu.dimension_semantics<parallel>], iteration_bounds = array<i64: 1>, scalar_prefetch = 0 : i64, scratch_operands = 0 : i64, tpu.core_type = #tpu.core_type<tc>, window_params = [{pipeline_mode = #tpu.pipeline_mode<synchronous>, transform_indices = @transform_0, window_bounds = array<i64: 1, 3>}, {transform_indices = @transform_1, window_bounds = array<i64: 32, 8>}, {transform_indices = @transform_2, window_bounds = array<i64: 32, 3>}]} {
    %c0 = arith.constant 0 : index
    %c0_0 = arith.constant 0 : index
    %0 = vector.load %arg2[%c0, %c0_0] : memref<32x8xf32, #tpu.memory_space<vmem>>, vector<32x3xf32>
    %c0_1 = arith.constant 0 : index
    %c0_2 = arith.constant 0 : index
    %1 = vector.load %arg1[%c0_1, %c0_2] : memref<1x3xf32, #tpu.memory_space<vmem>>, vector<1x3xf32>
    %2 = vector.broadcast %1 : vector<1x3xf32> to vector<32x3xf32>
    %3 = arith.mulf %0, %2 : vector<32x3xf32>
    %c0_3 = arith.constant 0 : index
    %c0_4 = arith.constant 0 : index
    %4 = vector.load %arg3[%c0_3, %c0_4] : memref<32x3xf32, #tpu.memory_space<vmem>>, vector<32x3xf32>
    tpu.vector_store %arg3[%c0_3, %c0_4], %3 {strides = array<i32>} : memref<32x3xf32, #tpu.memory_space<vmem>>, vector<32x3xf32>,
    return
  }
  func.func @transform_0(%arg0: i32) -> (i32, i32) {
    %c0_i32 = arith.constant 0 : i32
    %c0_i32_0 = arith.constant 0 : i32
    %c0_i32_1 = arith.constant 0 : i32
    return %c0_i32, %c0_i32_0 : i32, i32
  }
  func.func @transform_1(%arg0: i32) -> (i32, i32) {
    %c0_i32 = arith.constant 0 : i32
    %c0_i32_0 = arith.constant 0 : i32
    return %arg0, %c0_i32 : i32, i32
  }
  func.func @transform_2(%arg0: i32) -> (i32, i32) {
    %c0_i32 = arith.constant 0 : i32
    %c0_i32_0 = arith.constant 0 : i32
    return %arg0, %c0_i32 : i32, i32
  }
}

</mosaic_0001>

<bundles_post_ra>
// kernel: tpu_custom_call.1
= control target key start
LH: loop header
LB: loop body
LE: loop exit
PB: predicated region body
PF: predicated region fallthrough
CT: control target
= control target key end

     0   :  { %vm23_vm0 = vcmask 23552   ;;  %s75_s0 = inlined_call_operand.vmem [shape: f32[1,3], index: 0, kind: input, shape index: {}]   ;;  %s76_s1 = inlined_call_operand.vmem [shape: f32[32,8], index: 1, kind: input, shape index: {}]   ;;  %s77_s2 = inlined_call_operand.vmem [shape: f32[32,3], index: 2, kind: output, shape index: {}]  }
   0x1   :  { %v11_v0 = vld [vmem:[%s76_s1] sm:$0xff]  ;;  %v12_v2 = vld [vmem:[%s76_s1 + $0x8] sm:$0xff]  ;;  %v13_v3 = vld [vmem:[%s76_s1 + $0x10] sm:$0xff] }
   0x2   :  { %v32_v1 = vld [vmem:[%s75_s0] ss:$0 sm:$0xff]  ;;  %v14_v4 = vld [vmem:[%s76_s1 + $0x18] sm:$0xff] }
   0x3   :  { %v19_v5 = vmul.f32 %v32_v1, %v11_v0  ;;  %v20_v6 = vmul.f32 %v32_v1, %v12_v2  ;;  %v21_v7 = vmul.f32 %v32_v1, %v13_v3  ;;  %v22_v8 = vmul.f32 %v32_v1, %v14_v4 }
   0x5   :  { %24 = vst.msk [vmem:[%s77_s2] sm:$0xff] %vm23_vm0, %v19_v5 }
   0x6   :  { %25 = vst.msk [vmem:[%s77_s2 + $0x8] sm:$0xff] %vm23_vm0, %v20_v6 }
   0x7   :  { %26 = vst.msk [vmem:[%s77_s2 + $0x10] sm:$0xff] %vm23_vm0, %v21_v7 }
   0x8   :  { %27 = vst.msk [vmem:[%s77_s2 + $0x18] sm:$0xff] %vm23_vm0, %v22_v8 }

</bundles_post_ra>
